<compile_context>
chip_gen: v7x
topology: tpu7x:2x2x1
jax: 0.10.0
libtpu: 0.0.40
codegen_flags: <defaults>
</compile_context>

<pallas_src>
import functools

import jax
import jax.numpy as jnp
from jax import lax
from jax.experimental import pallas as pl
from jax.experimental.pallas import tpu as pltpu

EPS = 0.001
_INV_SQRT2 = 0.7071067811865476
_VMEM_LIMIT = 32 * 1024 * 1024          # safe scoped-VMEM ceiling on all gens
_STATS_TILE_BYTES = 4 * 1024 * 1024     # pass 1: only x is double-buffered
_APPLY_TILE_BYTES = 2 * 1024 * 1024     # pass 2: x + out double-buffered


def _stats_kernel(x_ref, gamma_ref, beta_ref, scale_ref, bias_ref,
                  sum_sc, sq_sc, *, inv_count, l_total, l_tile, needs_mask):
    # x_ref: (1, C_tile, L_tile); gamma/beta/scale/bias: (C_tile, 1)
    ni = pl.program_id(1)   # batch index      (reduction axis)
    li = pl.program_id(2)   # lane-tile index  (reduction axis)

    @pl.when(jnp.logical_and(ni == 0, li == 0))
    def _init():
        sum_sc[...] = jnp.zeros_like(sum_sc)
        sq_sc[...] = jnp.zeros_like(sq_sc)

    x = x_ref[0].astype(jnp.float32)              # (C_tile, L_tile)
    if needs_mask:
        # Zero out-of-range lanes of the last L tile so they don't pollute
        # the accumulators.  (Garbage channels in a partial C tile only
        # produce garbage stats that land in the masked OOB output store.)
        remaining = l_total - li * l_tile
        lane = lax.broadcasted_iota(jnp.int32, x.shape, 1)
        x = jnp.where(lane < remaining, x, 0.0)

    # Single-sweep stats: sum and sum-of-squares, f32 accumulation (XLU
    # cross-lane reduces run in their own slot; the pass stays HBM-bound).
    sum_sc[...] += jnp.sum(x, axis=-1, keepdims=True)
    sq_sc[...] += jnp.sum(x * x, axis=-1, keepdims=True)

    is_last = jnp.logical_and(ni == pl.num_programs(1) - 1,
                              li == pl.num_programs(2) - 1)

    @pl.when(is_last)
    def _finalize():
        mean = sum_sc[...] * inv_count
        var = jnp.maximum(sq_sc[...] * inv_count - mean * mean, 0.0)
        inv_std = lax.rsqrt(var + EPS)
        scale = gamma_ref[...] * inv_std          # folded affine: y = x*s + b
        scale_ref[...] = scale
        bias_ref[...] = beta_ref[...] - mean * scale


def _apply_kernel(x_ref, scale_ref, bias_ref, o_ref):
    x = x_ref[0].astype(jnp.float32)              # (C_tile, L_tile)
    y = x * scale_ref[...] + bias_ref[...]        # one mul + one add per elem
    out = 0.5 * y * (1.0 + lax.erf(y * _INV_SQRT2))   # exact GELU
    o_ref[0] = out.astype(o_ref.dtype)


def _choose_tiles(C, L, tile_budget_bytes):
    # Channel (sublane) tile: multiple of 8, or the full C extent.
    if C % 8 == 0:
        c_tile = min(C, 128)
    else:
        c_tile = C
    # Lane tile: multiple of 128 (lane-dense loads/stores), sized so one f32
    # tile stays within the per-tile VMEM budget.
    budget_elems = tile_budget_bytes // 4
    max_lanes = max(128, (budget_elems // max(c_tile, 1)) // 128 * 128)
    if L % 128 == 0:
        l_tile = min(L, max_lanes)
    elif L <= max_lanes:
        l_tile = L                 # full lane extent (legal when not /128)
    else:
        l_tile = max_lanes         # remainder tile handled by masking
    return c_tile, l_tile


def bn_gelu(x_nchw, gamma, beta):
    """BatchNorm2d(eps=1e-3, batch stats) + exact GELU.  x: (N, C, H, W)."""
    N, C, H, W = x_nchw.shape
    L = H * W
    x3 = x_nchw.reshape(N, C, L)                  # free reshape, no transpose
    gamma2 = gamma.reshape(C, 1).astype(jnp.float32)
    beta2 = beta.reshape(C, 1).astype(jnp.float32)

    # ---- Pass 1: per-channel batch statistics -> folded (scale, bias). ----
    c_tile, l_tile_s = _choose_tiles(C, L, _STATS_TILE_BYTES)
    grid_s = (pl.cdiv(C, c_tile), N, pl.cdiv(L, l_tile_s))
    x_spec_s = pl.BlockSpec((1, c_tile, l_tile_s),
                            lambda ci, ni, li: (ni, ci, li))
    vec_spec = pl.BlockSpec((c_tile, 1), lambda ci, ni, li: (ci, 0))

    stats_kernel = functools.partial(
        _stats_kernel,
        inv_count=1.0 / float(N * L),
        l_total=L,
        l_tile=l_tile_s,
        needs_mask=(L % l_tile_s) != 0,
    )
    scale, bias = pl.pallas_call(
        stats_kernel,
        out_shape=(jax.ShapeDtypeStruct((C, 1), jnp.float32),
                   jax.ShapeDtypeStruct((C, 1), jnp.float32)),
        grid=grid_s,
        in_specs=[x_spec_s, vec_spec, vec_spec],
        out_specs=(vec_spec, vec_spec),
        scratch_shapes=[pltpu.VMEM((c_tile, 1), jnp.float32),
                        pltpu.VMEM((c_tile, 1), jnp.float32)],
        compiler_params=pltpu.CompilerParams(
            dimension_semantics=("parallel", "arbitrary", "arbitrary"),
            vmem_limit_bytes=_VMEM_LIMIT),
    )(x3, gamma2, beta2)

    # ---- Pass 2: normalize + GELU (fully parallel, pipelined tiles). ----
    _, l_tile_a = _choose_tiles(C, L, _APPLY_TILE_BYTES)
    grid_a = (pl.cdiv(C, c_tile), N, pl.cdiv(L, l_tile_a))
    x_spec_a = pl.BlockSpec((1, c_tile, l_tile_a),
                            lambda ci, ni, li: (ni, ci, li))

    out3 = pl.pallas_call(
        _apply_kernel,
        out_shape=jax.ShapeDtypeStruct((N, C, L), x_nchw.dtype),
        grid=grid_a,
        in_specs=[x_spec_a, vec_spec, vec_spec],
        out_specs=x_spec_a,
        compiler_params=pltpu.CompilerParams(
            dimension_semantics=("parallel", "parallel", "arbitrary"),
            vmem_limit_bytes=_VMEM_LIMIT),
    )(x3, scale, bias)

    return out3.reshape(N, C, H, W)


if __name__ == "__main__":
    key = jax.random.PRNGKey(0)
    kx, kg, kb = jax.random.split(key, 3)
    N, C, H, W = 2, 4, 16, 16

    x = jax.random.normal(kx, (N, C, H, W), dtype=jnp.float32)
    gamma = 1.0 + 0.1 * jax.random.normal(kg, (C,), dtype=jnp.float32)
    beta = 0.1 * jax.random.normal(kb, (C,), dtype=jnp.float32)

    out = jax.block_until_ready(bn_gelu(x, gamma, beta))

    # Pure-JAX reference: training-mode BN (biased batch var) + exact GELU.
    xr = x.astype(jnp.float32)
    mean = jnp.mean(xr, axis=(0, 2, 3), keepdims=True)
    var = jnp.mean((xr - mean) ** 2, axis=(0, 2, 3), keepdims=True)
    yr = (xr - mean) * lax.rsqrt(var + EPS) * gamma.reshape(1, C, 1, 1) \
         + beta.reshape(1, C, 1, 1)
    ref = 0.5 * yr * (1.0 + lax.erf(yr / jnp.sqrt(2.0)))

    assert out.shape == ref.shape
    assert jnp.allclose(out, ref, atol=2e-5, rtol=1e-5), \
        float(jnp.max(jnp.abs(out - ref)))

    print("KERNEL_OK")
</pallas_src>

<mosaic_0001>
module attributes {stable_mosaic.version = 11 : i64} {
  func.func @_stats_kernel(%arg0: i32, %arg1: i32, %arg2: i32, %arg3: memref<1x4x256xf32, #tpu.memory_space<vmem>>, %arg4: memref<4x1xf32, #tpu.memory_space<vmem>>, %arg5: memref<4x1xf32, #tpu.memory_space<vmem>>, %arg6: memref<4x1xf32, #tpu.memory_space<vmem>>, %arg7: memref<4x1xf32, #tpu.memory_space<vmem>>, %arg8: memref<4x1xf32, #tpu.memory_space<vmem>>, %arg9: memref<4x1xf32, #tpu.memory_space<vmem>>) attributes {dimension_semantics = [#tpu.dimension_semantics<parallel>, #tpu.dimension_semantics<arbitrary>, #tpu.dimension_semantics<arbitrary>], iteration_bounds = array<i64: 1, 2, 1>, scalar_prefetch = 0 : i64, scratch_operands = 2 : i64, tpu.core_type = #tpu.core_type<tc>, window_params = [{transform_indices = @transform_0, window_bounds = array<i64: 1, 4, 256>}, {transform_indices = @transform_1, window_bounds = array<i64: 4, 1>}, {transform_indices = @transform_2, window_bounds = array<i64: 4, 1>}, {transform_indices = @transform_3, window_bounds = array<i64: 4, 1>}, {transform_indices = @transform_4, window_bounds = array<i64: 4, 1>}]} {
    %c0_i32 = arith.constant 0 : i32
    %0 = arith.cmpi eq, %arg1, %c0_i32 : i32
    %c0_i32_0 = arith.constant 0 : i32
    %1 = arith.cmpi eq, %arg2, %c0_i32_0 : i32
    %2 = arith.andi %0, %1 : i1
    %3 = arith.extui %2 : i1 to i32
    %c0_i32_1 = arith.constant 0 : i32
    %4 = arith.cmpi ne, %3, %c0_i32_1 : i32
    scf.if %4 {
      %cst_15 = arith.constant 0.000000e+00 : f32
      %23 = vector.broadcast %cst_15 : f32 to vector<4x1xf32>
      %c0_16 = arith.constant 0 : index
      %c0_17 = arith.constant 0 : index
      %24 = vector.load %arg8[%c0_16, %c0_17] : memref<4x1xf32, #tpu.memory_space<vmem>>, vector<4x1xf32>
      tpu.vector_store %arg8[%c0_16, %c0_17], %23 {strides = array<i32>} : memref<4x1xf32, #tpu.memory_space<vmem>>, vector<4x1xf32>,
      %cst_18 = arith.constant 0.000000e+00 : f32
      %25 = vector.broadcast %cst_18 : f32 to vector<4x1xf32>
      %c0_19 = arith.constant 0 : index
      %c0_20 = arith.constant 0 : index
      %26 = vector.load %arg9[%c0_19, %c0_20] : memref<4x1xf32, #tpu.memory_space<vmem>>, vector<4x1xf32>
      tpu.vector_store %arg9[%c0_19, %c0_20], %25 {strides = array<i32>} : memref<4x1xf32, #tpu.memory_space<vmem>>, vector<4x1xf32>,
    } else {
    }
    %c0 = arith.constant 0 : index
    %c0_2 = arith.constant 0 : index
    %c0_3 = arith.constant 0 : index
    %5 = vector.load %arg3[%c0, %c0_2, %c0_3] : memref<1x4x256xf32, #tpu.memory_space<vmem>>, vector<1x4x256xf32>
    %6 = vector.shape_cast %5 : vector<1x4x256xf32> to vector<4x256xf32>
    %c0_4 = arith.constant 0 : index
    %c0_5 = arith.constant 0 : index
    %7 = vector.load %arg8[%c0_4, %c0_5] : memref<4x1xf32, #tpu.memory_space<vmem>>, vector<4x1xf32>
    %cst = arith.constant dense<0.000000e+00> : vector<4xf32>
    %8 = vector.multi_reduction <add>, %6, %cst [1] : vector<4x256xf32> to vector<4xf32>
    %9 = vector.shape_cast %8 : vector<4xf32> to vector<4x1xf32>
    %10 = arith.addf %7, %9 : vector<4x1xf32>
    %c0_6 = arith.constant 0 : index
    %c0_7 = arith.constant 0 : index
    %11 = vector.load %arg8[%c0_6, %c0_7] : memref<4x1xf32, #tpu.memory_space<vmem>>, vector<4x1xf32>
    tpu.vector_store %arg8[%c0_6, %c0_7], %10 {strides = array<i32>} : memref<4x1xf32, #tpu.memory_space<vmem>>, vector<4x1xf32>,
    %c0_8 = arith.constant 0 : index
    %c0_9 = arith.constant 0 : index
    %12 = vector.load %arg9[%c0_8, %c0_9] : memref<4x1xf32, #tpu.memory_space<vmem>>, vector<4x1xf32>
    %13 = arith.mulf %6, %6 : vector<4x256xf32>
    %cst_10 = arith.constant dense<0.000000e+00> : vector<4xf32>
    %14 = vector.multi_reduction <add>, %13, %cst_10 [1] : vector<4x256xf32> to vector<4xf32>
    %15 = vector.shape_cast %14 : vector<4xf32> to vector<4x1xf32>
    %16 = arith.addf %12, %15 : vector<4x1xf32>
    %c0_11 = arith.constant 0 : index
    %c0_12 = arith.constant 0 : index
    %17 = vector.load %arg9[%c0_11, %c0_12] : memref<4x1xf32, #tpu.memory_space<vmem>>, vector<4x1xf32>
    tpu.vector_store %arg9[%c0_11, %c0_12], %16 {strides = array<i32>} : memref<4x1xf32, #tpu.memory_space<vmem>>, vector<4x1xf32>,
    %c1_i32 = arith.constant 1 : i32
    %18 = arith.cmpi eq, %arg1, %c1_i32 : i32
    %c0_i32_13 = arith.constant 0 : i32
    %19 = arith.cmpi eq, %arg2, %c0_i32_13 : i32
    %20 = arith.andi %18, %19 : i1
    %21 = arith.extui %20 : i1 to i32
    %c0_i32_14 = arith.constant 0 : i32
    %22 = arith.cmpi ne, %21, %c0_i32_14 : i32
    scf.if %22 {
      %c0_15 = arith.constant 0 : index
      %c0_16 = arith.constant 0 : index
      %23 = vector.load %arg8[%c0_15, %c0_16] : memref<4x1xf32, #tpu.memory_space<vmem>>, vector<4x1xf32>
      %cst_17 = arith.constant 0.001953125 : f32
      %24 = vector.broadcast %cst_17 : f32 to vector<4x1xf32>
      %25 = arith.mulf %23, %24 : vector<4x1xf32>
      %c0_18 = arith.constant 0 : index
      %c0_19 = arith.constant 0 : index
      %26 = vector.load %arg9[%c0_18, %c0_19] : memref<4x1xf32, #tpu.memory_space<vmem>>, vector<4x1xf32>
      %cst_20 = arith.constant 0.001953125 : f32
      %27 = vector.broadcast %cst_20 : f32 to vector<4x1xf32>
      %28 = arith.mulf %26, %27 : vector<4x1xf32>
      %29 = arith.mulf %25, %25 : vector<4x1xf32>
      %30 = arith.subf %28, %29 : vector<4x1xf32>
      %cst_21 = arith.constant 0.000000e+00 : f32
      %31 = vector.broadcast %cst_21 : f32 to vector<4x1xf32>
      %32 = arith.maximumf %30, %31 : vector<4x1xf32>
      %cst_22 = arith.constant 1.000000e-03 : f32
      %33 = vector.broadcast %cst_22 : f32 to vector<4x1xf32>
      %34 = arith.addf %32, %33 : vector<4x1xf32>
      %35 = math.rsqrt %34 : vector<4x1xf32>
      %c0_23 = arith.constant 0 : index
      %c0_24 = arith.constant 0 : index
      %36 = vector.load %arg4[%c0_23, %c0_24] : memref<4x1xf32, #tpu.memory_space<vmem>>, vector<4x1xf32>
      %37 = arith.mulf %36, %35 : vector<4x1xf32>
      %c0_25 = arith.constant 0 : index
      %c0_26 = arith.constant 0 : index
      %38 = vector.load %arg6[%c0_25, %c0_26] : memref<4x1xf32, #tpu.memory_space<vmem>>, vector<4x1xf32>
      tpu.vector_store %arg6[%c0_25, %c0_26], %37 {strides = array<i32>} : memref<4x1xf32, #tpu.memory_space<vmem>>, vector<4x1xf32>,
      %c0_27 = arith.constant 0 : index
      %c0_28 = arith.constant 0 : index
      %39 = vector.load %arg5[%c0_27, %c0_28] : memref<4x1xf32, #tpu.memory_space<vmem>>, vector<4x1xf32>
      %40 = arith.mulf %25, %37 : vector<4x1xf32>
      %41 = arith.subf %39, %40 : vector<4x1xf32>
      %c0_29 = arith.constant 0 : index
      %c0_30 = arith.constant 0 : index
      %42 = vector.load %arg7[%c0_29, %c0_30] : memref<4x1xf32, #tpu.memory_space<vmem>>, vector<4x1xf32>
      tpu.vector_store %arg7[%c0_29, %c0_30], %41 {strides = array<i32>} : memref<4x1xf32, #tpu.memory_space<vmem>>, vector<4x1xf32>,
    } else {
    }
    return
  }
  func.func @transform_0(%arg0: i32, %arg1: i32, %arg2: i32) -> (i32, i32, i32) {
    %c0_i32 = arith.constant 0 : i32
    return %arg1, %arg0, %arg2 : i32, i32, i32
  }
  func.func @transform_1(%arg0: i32, %arg1: i32, %arg2: i32) -> (i32, i32) {
    %c0_i32 = arith.constant 0 : i32
    %c0_i32_0 = arith.constant 0 : i32
    return %arg0, %c0_i32 : i32, i32
  }
  func.func @transform_2(%arg0: i32, %arg1: i32, %arg2: i32) -> (i32, i32) {
    %c0_i32 = arith.constant 0 : i32
    %c0_i32_0 = arith.constant 0 : i32
    return %arg0, %c0_i32 : i32, i32
  }
  func.func @transform_3(%arg0: i32, %arg1: i32, %arg2: i32) -> (i32, i32) {
    %c0_i32 = arith.constant 0 : i32
    %c0_i32_0 = arith.constant 0 : i32
    return %arg0, %c0_i32 : i32, i32
  }
  func.func @transform_4(%arg0: i32, %arg1: i32, %arg2: i32) -> (i32, i32) {
    %c0_i32 = arith.constant 0 : i32
    %c0_i32_0 = arith.constant 0 : i32
    return %arg0, %c0_i32 : i32, i32
  }
}

</mosaic_0001>

<bundles_post_ra>
// kernel: tpu_custom_call.1
= control target key start
LH: loop header
LB: loop body
LE: loop exit
PB: predicated region body
PF: predicated region fallthrough
CT: control target
= control target key end

     0   :  { %10 = vsyncpa [#allocation5], 0  ;;  %s804_s0 = inlined_call_operand.hbm [shape: f32[2,4,256], index: 0, kind: input, shape index: {}]   ;;  %s805_s1 = inlined_call_operand.vmem [shape: f32[4,1], index: 1, kind: input, shape index: {}]   ;;  %s806_s2 = inlined_call_operand.vmem [shape: f32[4,1], index: 2, kind: input, shape index: {}]   ;;  %s807_s3 = inlined_call_operand.vmem [shape: f32[4,1], index: 3, kind: output, shape index: {0}]   ;;  %s808_s4 = inlined_call_operand.vmem [shape: f32[4,1], index: 4, kind: output, shape index: {1}]  }
   0x1   :  { %12 = vsyncpa [#allocation5 + $0x1], 0  ;;  %s666_s15 = smov 0   ;;  %s668_s16 = smov 0  }
   0x2   :  { %s670_s17 = smov 0   ;;  %s672_s18 = smov 0  }
   0x3   :  { %s674_s19 = smov 0   ;;  %s676_s20 = smov 0  }
   0x4 LB: > { %s479_s21 = sadd.s32 4294967295, %s637_s20   ;;  %s33_s22 = sadd.s32 1, %s633_s19  ;;  %s637_s20 = sphi %s676_s20, %s18_s20   ;;  %s633_s19 = sphi %s674_s19, %s818_s19   ;;  %s629_s18 = sphi %s672_s18, %s817_s18   ;;  %s625_s17 = sphi %s670_s17, %s816_s17   ;;  %s621_s16 = sphi %s668_s16, %s815_s16   ;;  %s617_s15 = sphi %s666_s15, %s814_s15  }
   0x5   : > { %p35_p0 = scmp.ge.s32.totalorder %s33_s22, 2  ;;  %s48_s23 = sadd.s32 1, %s625_s17 }
   0x6   : > { %p55_p1 = scmp.ne.s32.totalorder %s625_s17, %s621_s16  ;;  %p56_p2 = scmp.eq.s32.totalorder %s637_s20, 0 }
   0x7   : > { %s820_s22 = smov (%p35_p0, %s33_s22), 0  ;;  %p61_p4 = scmp.ne.s32.totalorder %s621_s16, %s617_s15 }
   0x8   : > { %p702_p3 = por %p56_p2, %p55_p1  ;;  %s41_s25 = ssub.s32 %s633_s19, %s820_s22 }
   0x9   : > { %p62_p5 = scmp.eq.s32.totalorder %s479_s21, 0  ;;  %p46_p6 = scmp.eq.s32.totalorder %s41_s25, 0 }
   0xa   : > { %p504_p8 = scmp.lt.s32.totalorder %s637_s20, 2  ;;  %s203_s28 = sand.u32 1, %s625_s17  }
   0xb   : > { %p709_p7 = por %p62_p5, %p61_p4  ;;  %s495_s29 = sshll.u32 %s633_s19, 7 }
   0xc   : > { %s715_s27 = scalar_select %p46_p6, %s625_s17, %s48_s23  }
   0xd   : > { %s484_s30 = sshll.u32 %s203_s28, 3  ;;  %s722_s7 = scalar_lea.hbm %s804_s0, %s495_s29 }
   0xe   : > { %s207_s8 = scalar_lea.vmem [#allocation4], %s484_s30  ;;  %p726_p9 = pnand %p504_p8, %p702_p3 }
   0xf   : > { %s219_s9 = sshll.u32 %s207_s8, 4  ;;  %s204_s11 = scalar_lea.sflag [#allocation5], %s203_s28  ;;  %s730_s9 = int_to_ptr.vmem [resolvable:$true] %s219_s9 }
  0x10   : > { %s557_s12 = scalar_lea.hbm %s722_s7, 128  ;;  %p559_p13 = pneg %p726_p9 }
  0x11   : > { %p558_p12 = scmp.ne.s32.totalorder %s722_s7, %s557_s12  ;;  %s562_s15 = scalar_lea.hbm %s804_s0, 256 }
  0x12   : > { %p563_p2 = scmp.lt.u32.totalorder %s722_s7, %s804_s0  ;;  %p564_p3 = scmp.lt.u32.totalorder %s562_s15, %s557_s12 }
  0x13   : > { %p560_p0 = pnand %p559_p13, %p558_p12  ;;  %p566_p5 = scmp.lt.u32.totalorder %s557_s12, %s722_s7 }
  0x14   : > { %p565_p4 = por %p564_p3, %p563_p2 }
  0x15   : > { %p561_p1 = pneg %p560_p0 }
  0x16   : > { %p567_p6 = por %p566_p5, %p565_p4 }
  0x18   : > { %p568_p8 = pnand %p567_p6, %p561_p1 }
  0x1a   : > { %571 = shalt.err (!%p568_p8)
}
  0x1b   : > { %s572_s24 = scalar_lea.vmem %s730_s9, 128  ;;  %s639_s25 = smov [#allocation4]  }
  0x1c   : > { %p573_p12 = scmp.ne.s32.totalorder %s730_s9, %s572_s24  ;;  %s577_s28 = sshll.u32 %s639_s25, 4  ;;  %s578_s28 = int_to_ptr.vmem [resolvable:$false] %s577_s28 }
  0x1d   : > { %s579_s29 = scalar_lea.vmem %s578_s28, 256  ;;  %p580_p11 = scmp.lt.s32.totalorder %s730_s9, %s578_s28 }
  0x1e   : > { %p575_p0 = pnand %p573_p12, %p559_p13  ;;  %p581_p2 = scmp.lt.s32.totalorder %s579_s29, %s572_s24 }
  0x20   : > { %p576_p10 = pneg %p575_p0  ;;  %p582_p3 = por %p581_p2, %p580_p11 }
  0x22   : > { %p583_p4 = pnand %p582_p3, %p576_p10 }
  0x24   : > { %586 = shalt.err (!%p583_p4)
}
  0x25   : > { %503 = dma.hbm_to_vmem [thread:$0]  (!%p726_p9), %s722_s7, 128, %s730_s9, %s204_s11  }
  0x26   : > { %p812_p1 = scmp.lt.s32.totalorder %s637_s20, 3  ;;  %p813_p5 = scmp.ge.s32.totalorder %s637_s20, 1 }
  0x28   : > { %p225_p13 = pnand %p813_p5, %p812_p1 }
  0x29   : > { %s230_s30 = sand.u32 (!%p225_p13), 1, %s621_s16  }
  0x2a   : > { %228 = sbr.rel (%p225_p13) target bundleno = 247 (0xf7), region = 32  ;;  %s488_s5 = sshll.u32 (!%p225_p13), %s230_s30, 3 }
  0x2b   : > { %s231_s6 = scalar_lea.sflag (!%p225_p13), [#allocation5], %s230_s30  ;;  %s234_s8 = scalar_lea.vmem (!%p225_p13), [#allocation4], %s488_s5 }
  0x31   : > { %612 = dma.done.wait (%p709_p7), %s231_s6, 128  }
  0x32   : > { %614 = vsyncadd (%p709_p7), %s231_s6, 4294967168  ;;  %p287_p10 = scmp.eq.s32.totalorder %s629_s18, 0 }
  0x33   : > { %vm293_vm0 = vcmask (%p287_p10), 3072   ;;  %v640_v0 = vmov (%p287_p10), 0.0  }
  0x34   : > { %292 = sbr.rel (!%p287_p10) target bundleno = 59 (0x3b), region = 40  ;;  %294 = vst.msk [vmem:[#allocation2] sm:$0xf] (%p287_p10), %vm293_vm0, %v640_v0  ;;  %295 = vst.msk [vmem:[#allocation3] sm:$0xf] (%p287_p10), %vm293_vm0, %v640_v0 }
  0x3b PF: > { %v296_v1 = vld [vmem:[%s234_s8] sm:$0xff]  ;;  %vm301_vm1 = vcmask 1043456   ;;  %p322_p7 = scmp.eq.s32.totalorder %s629_s18, 1  ;;  %v297_v11 = vld [vmem:[#allocation2] sm:$0xf]  ;;  %vm308_vm2 = vcmask 3072  }
  0x3c   : > { %v299_v2 = vcombine.high %v296_v1, %v296_v1  ;;  %v302_v3 = vsel %vm301_vm1, %v296_v1, 0.0  ;;  %v311_v4 = vmul.f32 %v296_v1, %v296_v1  ;;  %v310_v14 = vld [vmem:[#allocation3] sm:$0xf]  ;;  %v336_v25 = vld [vmem:[%s805_s1] sm:$0xf] (%p322_p7) }
  0x3d   : > { %v339_v28 = vld [vmem:[%s806_s2] sm:$0xf] (%p322_p7) }
  0x3e   : > { %v303_v5 = vsel %vm301_vm1, %v299_v2, 0.0  ;;  %v313_v6 = vcombine.high %v311_v4, %v311_v4  ;;  %v315_v7 = vsel %vm301_vm1, %v311_v4, 0.0 }
  0x3f   : > { %v304_v8 = vadd.f32 %v303_v5, %v302_v3 }
  0x40   : > { %v316_v9 = vsel %vm301_vm1, %v313_v6, 0.0 }
  0x41   : > { %305 = vadd.xlane.f32.xlu0 %v304_v8  ;;  %v317_v10 = vadd.f32 %v316_v9, %v315_v7 }
  0x45   : > { %318 = vadd.xlane.f32.xlu0 %v317_v10 }
  0xce   : > { %v306_v12 = vpop.xlane.xlu0 %305 }
  0xcf   : > { %v307_v13 = vadd.f32 %v306_v12, %v297_v11  ;;  %326 = sbr.rel (!%p322_p7) target bundleno = 247 (0xf7), region = 44 }
  0xd1   : > { %309 = vst.msk [vmem:[#allocation2] sm:$0xf] %vm308_vm2, %v307_v13 }
  0xd2   : > { %v319_v15 = vpop.xlane.xlu0 %318 }
  0xd3   : > { %v320_v16 = vadd.f32 %v319_v15, %v310_v14 }
  0xd5   : > { %321 = vst.msk [vmem:[#allocation3] sm:$0xf] %vm308_vm2, %v320_v16 }
  0xd8   : > { %v327_v17 = vld [vmem:[#allocation2] sm:$0xf] }
  0xd9   : > { %v328_v19 = vmul.f32 0.001953125, %v327_v17 }
  0xdb   : > { %v331_v21 = vmul.f32 %v328_v19, %v328_v19 }
  0xdc   : > { %v329_v18 = vld [vmem:[#allocation3] sm:$0xf] }
  0xdd   : > { %v330_v20 = vmul.f32 0.001953125, %v329_v18 }
  0xdf   : > { %v332_v22 = vsub.f32 %v330_v20, %v331_v21 }
  0xe1   : > { %v333_v23 = vmax.f32 %v332_v22, 0.0 }
  0xe3   : > { %v334_v24 = vadd.f32 0.001, %v333_v23 }
  0xe5   : > { %555 = vrsqrt.f32 %v334_v24 }
  0xef   : > { %v556_v26 = vpop.eup %555 }
  0xf0   : > { %v337_v27 = vmul.f32 %v556_v26, %v336_v25 }
  0xf2   : > { %338 = vst.msk [vmem:[%s807_s3] sm:$0xf] %vm308_vm2, %v337_v27  ;;  %v340_v29 = vmul.f32 %v337_v27, %v328_v19 }
  0xf4   : > { %v341_v30 = vsub.f32 %v339_v28, %v340_v29 }
  0xf6   : > { %342 = vst.msk [vmem:[%s808_s4] sm:$0xf] %vm308_vm2, %v341_v30 }
  0xf7 PF: > { %s18_s20 = sadd.s32 1, %s637_s20   ;;  %s814_s15 = smov %s621_s16 }
  0xf8   : > { %p15_p9 = scmp.ge.s32.totalorder %s18_s20, 4   ;;  %s815_s16 = smov %s625_s17 }
  0xf9   : > { %s816_s17 = smov %s715_s27  ;;  %s817_s18 = smov %s633_s19 }
  0xfa   : > { %s818_s19 = smov %s820_s22  ;;  %17 = sbr.rel (!%p15_p9) target bundleno = 4 (0x4), region = 98 }
 0x101   :  { %376 = vsyncpa [#allocation5], 1 }
 0x102   :  { %378 = vsyncpa [#allocation5 + $0x1], 1 }

</bundles_post_ra>
